<compile_context>
chip_gen: v5e
topology: v5e:2x2
jax: 0.10.0
libtpu: 0.0.40
codegen_flags: <defaults>
</compile_context>

<pallas_src>
import functools
import math

import jax
import jax.numpy as jnp
import numpy as np
from jax import lax
from jax.experimental import pallas as pl
from jax.experimental.pallas import tpu as pltpu

# Finite mask value (safer than -inf: no NaN from (-inf)-(-inf) in the
# online-softmax rescale); stays f32 until after the max-subtraction.
_MASK_VALUE = float(jnp.finfo(jnp.float32).min)


def _pick_vmem_limit_bytes():
    """Per-generation scoped-VMEM request with headroom under the physical cap."""
    cap = None
    try:
        cap = getattr(pltpu.get_tpu_info(), "vmem_capacity_bytes", None)
    except Exception:
        cap = None
    if not cap:
        cap = 64 * 1024 * 1024  # conservative fallback (v7x-sized)
    # v5e/v6e (128 MiB) -> 100 MiB; v7x (64 MiB) -> 48 MiB.
    return int(max(32 * 1024 * 1024,
                   min(cap - 16 * 1024 * 1024, 100 * 1024 * 1024)))


# -----------------------------------------------------------------------------
# Kernel 1: QKV projection  (x @ W_qkv^T + b)  ->  q, k, v in (B, T, C) layout
# -----------------------------------------------------------------------------
def _qkv_proj_kernel(x_ref, wT_ref, b_ref, q_ref, k_ref, v_ref, *, C):
    x = x_ref[0]                                                    # (tq, C)
    # Single (tq, C) x (C, 3C) MXU matmul, f32 accumulation, f32 bias add.
    qkv = jnp.dot(x, wT_ref[...], preferred_element_type=jnp.float32) + b_ref[0]
    q_ref[0] = qkv[:, 0 * C:1 * C].astype(q_ref.dtype)
    k_ref[0] = qkv[:, 1 * C:2 * C].astype(k_ref.dtype)
    v_ref[0] = qkv[:, 2 * C:3 * C].astype(v_ref.dtype)


# -----------------------------------------------------------------------------
# Kernel 2: flash-style causal attention + fused output projection
#           (flat lower-triangular schedule via scalar-prefetched tile tables)
# -----------------------------------------------------------------------------
def _flash_attn_kernel(qi_tab, ki_tab, q_ref, k_ref, v_ref, woT_ref, bo_ref,
                       o_ref, m_sc, l_sc, acc_sc, *, H, D, approx_recip):
    t = pl.program_id(1)            # flat (q-tile, kv-tile) pair index
    qi = qi_tab[t]                  # query-tile index for this step
    ki = ki_tab[t]                  # kv-tile index  (ki <= qi by construction)

    @pl.when(ki == 0)
    def _init():
        m_sc[...] = jnp.full(m_sc.shape, -jnp.inf, dtype=m_sc.dtype)
        l_sc[...] = jnp.zeros(l_sc.shape, dtype=l_sc.dtype)
        acc_sc[...] = jnp.zeros(acc_sc.shape, dtype=acc_sc.dtype)

    q = q_ref[0]                                                    # (tq,  C)
    k = k_ref[0]                                                    # (tkv, C)
    v = v_ref[0]                                                    # (tkv, C)
    tq, tkv = q.shape[0], k.shape[0]

    def _scores(h):
        # Per-head 2-D dot keeps T on the lane axis and feeds the MXU directly.
        hs = slice(h * D, (h + 1) * D)
        return lax.dot_general(q[:, hs], k[:, hs], (((1,), (1,)), ((), ())),
                               preferred_element_type=jnp.float32)   # (tq,tkv)

    def _update(h, s):
        m_prev = m_sc[h]                                            # (tq, 1)
        m_new = jnp.maximum(m_prev, jnp.max(s, axis=-1, keepdims=True))
        alpha = jnp.exp(m_prev - m_new)
        p = jnp.exp(s - m_new)                                      # unnormalized
        m_sc[h] = m_new
        l_sc[h] = alpha * l_sc[h] + jnp.sum(p, axis=-1, keepdims=True)
        # p cast to the activation dtype keeps bf16 models on the fast MXU
        # path; accumulation stays f32.
        acc_sc[h] = alpha * acc_sc[h] + jnp.dot(
            p.astype(v.dtype), v[:, h * D:(h + 1) * D],
            preferred_element_type=jnp.float32)

    # TODO(synk): for H >= 12 (or D a multiple of 128) move heads to a grid
    # axis / fori_loop instead of this static unroll to bound vreg live ranges.

    # Interior (strictly below-diagonal) tiles: causal mask is all-True -> skip
    # the (tq,tkv) select entirely.
    @pl.when(ki < qi)
    def _interior():
        for h in range(H):
            _update(h, _scores(h))

    # Diagonal tile: apply the causal mask, then finalize this q-tile
    # (normalize once per head and do ONE fused output-projection matmul).
    @pl.when(ki == qi)
    def _diag():
        row = lax.broadcasted_iota(jnp.int32, (tq, tkv), 0)
        col = lax.broadcasted_iota(jnp.int32, (tq, tkv), 1)
        keep = col <= row
        heads = []
        for h in range(H):
            s = jnp.where(keep, _scores(h), _MASK_VALUE)
            _update(h, s)
            inv_l = pl.reciprocal(l_sc[h], approx=approx_recip)     # (tq, 1)
            heads.append((acc_sc[h] * inv_l).astype(woT_ref.dtype)) # (tq, D)
        a = jnp.concatenate(heads, axis=-1)                         # (tq, C)
        y = jnp.dot(a, woT_ref[...], preferred_element_type=jnp.float32)
        o_ref[0] = (y + bo_ref[0]).astype(o_ref.dtype)


# -----------------------------------------------------------------------------
# Wrapper
# -----------------------------------------------------------------------------
def causal_self_attention(x, w_qkv, b_qkv, w_out, b_out, num_head,
                          *, block_q=256, block_kv=256):
    """y = out_proj(causal_sdpa(qkv_proj(x))); matches the PyTorch module."""
    B, T, C = x.shape
    H = num_head
    assert C % H == 0, "embed_dim must be divisible by num_head"
    D = C // H
    dt = x.dtype

    # Square tiles keep the per-tile causal reasoning (interior vs diagonal) exact.
    tq = tkv = min(block_q, block_kv, T)
    assert T % tq == 0, "sequence length must be divisible by the tile size"
    nq = T // tq

    # Pre-transpose, fold the 1/sqrt(D) scale into the q columns, and cast the
    # weights to the activation dtype once in the wrapper (free at runtime).
    # Biases stay f32 (added to the f32 accumulators).
    scale = 1.0 / math.sqrt(D)
    col_scale = jnp.concatenate([jnp.full((C,), scale, jnp.float32),
                                 jnp.ones((2 * C,), jnp.float32)])
    w_qkv_t = (jnp.transpose(w_qkv).astype(jnp.float32)
               * col_scale[None, :]).astype(dt)                     # (C, 3C)
    w_out_t = jnp.transpose(w_out).astype(dt)                       # (C, C)
    b_qkv2 = (b_qkv.astype(jnp.float32) * col_scale).reshape(1, 3 * C)
    b_out2 = b_out.astype(jnp.float32).reshape(1, C)

    # Exact reciprocal for f32 models; EUP approximate reciprocal for bf16.
    approx_recip = bool(jnp.dtype(dt) != jnp.dtype(jnp.float32))
    vmem_limit = _pick_vmem_limit_bytes()

    # ---- 1) QKV projection --------------------------------------------------
    # TODO(synk): for C >= ~2048 on v7x (64 MiB VMEM) tile the 3C output dim of
    # W_qkv^T with an extra grid axis instead of keeping it resident.
    q, k, v = pl.pallas_call(
        functools.partial(_qkv_proj_kernel, C=C),
        out_shape=(jax.ShapeDtypeStruct((B, T, C), dt),) * 3,
        grid_spec=pltpu.PrefetchScalarGridSpec(
            num_scalar_prefetch=0,
            grid=(B, nq),
            in_specs=[
                pl.BlockSpec((1, tq, C), lambda b, i: (b, i, 0)),        # x
                pl.BlockSpec((C, 3 * C), lambda b, i: (0, 0),            # W_qkv^T
                             pipeline_mode=pl.Buffered(1)),
                pl.BlockSpec((1, 3 * C), lambda b, i: (0, 0),            # b_qkv
                             pipeline_mode=pl.Buffered(1)),
            ],
            out_specs=(
                pl.BlockSpec((1, tq, C), lambda b, i: (b, i, 0)),
                pl.BlockSpec((1, tq, C), lambda b, i: (b, i, 0)),
                pl.BlockSpec((1, tq, C), lambda b, i: (b, i, 0)),
            ),
        ),
        compiler_params=pltpu.CompilerParams(
            dimension_semantics=("parallel", "parallel"),
            vmem_limit_bytes=vmem_limit),
    )(x, w_qkv_t, b_qkv2)

    # ---- 2) causal flash attention + output projection ----------------------
    # Flat lower-triangular schedule: only the nq*(nq+1)/2 valid (qi, ki) tile
    # pairs are visited; the diagonal pair is last for each qi.
    qi_list, ki_list = [], []
    for qi_ in range(nq):
        for ki_ in range(qi_ + 1):
            qi_list.append(qi_)
            ki_list.append(ki_)
    qi_tab = jnp.asarray(qi_list, dtype=jnp.int32)
    ki_tab = jnp.asarray(ki_list, dtype=jnp.int32)
    n_pairs = len(qi_list)

    def _q_map(b, t, qt, kt):
        return (b, qt[t], 0)

    def _kv_map(b, t, qt, kt):
        return (b, kt[t], 0)

    y = pl.pallas_call(
        functools.partial(_flash_attn_kernel, H=H, D=D,
                          approx_recip=approx_recip),
        out_shape=jax.ShapeDtypeStruct((B, T, C), dt),
        grid_spec=pltpu.PrefetchScalarGridSpec(
            num_scalar_prefetch=2,
            grid=(B, n_pairs),
            in_specs=[
                pl.BlockSpec((1, tq, C), _q_map),                        # q
                pl.BlockSpec((1, tkv, C), _kv_map),                      # k
                pl.BlockSpec((1, tkv, C), _kv_map),                      # v
                pl.BlockSpec((C, C), lambda b, t, qt, kt: (0, 0),        # W_out^T
                             pipeline_mode=pl.Buffered(1)),
                pl.BlockSpec((1, C), lambda b, t, qt, kt: (0, 0),        # b_out
                             pipeline_mode=pl.Buffered(1)),
            ],
            out_specs=pl.BlockSpec((1, tq, C), _q_map),
            scratch_shapes=[
                pltpu.VMEM((H, tq, 1), jnp.float32),    # running max  m
                pltpu.VMEM((H, tq, 1), jnp.float32),    # running sum  l
                pltpu.VMEM((H, tq, D), jnp.float32),    # unnormalized PV acc
            ],
        ),
        compiler_params=pltpu.CompilerParams(
            dimension_semantics=("parallel", "arbitrary"),
            vmem_limit_bytes=vmem_limit),
    )(qi_tab, ki_tab, q, k, v, w_out_t, b_out2)

    # TODO(synk): attention / residual dropout are identity in eval mode (p=0);
    # training-mode dropout is not implemented in this kernel.
    return y


# -----------------------------------------------------------------------------
# Pure-JAX reference and self-test
# -----------------------------------------------------------------------------
def _reference(x, w_qkv, b_qkv, w_out, b_out, num_head):
    B, T, C = x.shape
    H = num_head
    D = C // H
    qkv = x @ w_qkv.T + b_qkv
    q, k, v = jnp.split(qkv, 3, axis=-1)
    q = q.reshape(B, T, H, D).transpose(0, 2, 1, 3)
    k = k.reshape(B, T, H, D).transpose(0, 2, 1, 3)
    v = v.reshape(B, T, H, D).transpose(0, 2, 1, 3)
    s = jnp.einsum('bhtd,bhsd->bhts', q, k) / math.sqrt(D)
    mask = jnp.tril(jnp.ones((T, T), dtype=bool))
    s = jnp.where(mask[None, None], s, -jnp.inf)
    p = jax.nn.softmax(s, axis=-1)
    a = jnp.einsum('bhts,bhsd->bhtd', p, v)
    a = a.transpose(0, 2, 1, 3).reshape(B, T, C)
    return a @ w_out.T + b_out


if __name__ == "__main__":
    # Small shapes consistent with the module: embed_dim=32, num_head=4 (D=8);
    # seq=64 so 16-wide tiles exercise the online softmax, the triangular
    # schedule, and the masked-diagonal vs unmasked-interior paths.
    B, T, C, H = 2, 64, 32, 4

    key = jax.random.PRNGKey(0)
    kx, k1, k2, k3, k4 = jax.random.split(key, 5)
    x = jax.random.normal(kx, (B, T, C), dtype=jnp.float32)
    w_qkv = jax.random.normal(k1, (3 * C, C), dtype=jnp.float32) * (1.0 / math.sqrt(C))
    b_qkv = jax.random.normal(k2, (3 * C,), dtype=jnp.float32) * 0.02
    w_out = jax.random.normal(k3, (C, C), dtype=jnp.float32) * (1.0 / math.sqrt(C))
    b_out = jax.random.normal(k4, (C,), dtype=jnp.float32) * 0.02

    y_ref = _reference(x, w_qkv, b_qkv, w_out, b_out, num_head=H)

    # Tiled path: 16x16 attention tiles -> 10 triangular (qi, ki) pairs / batch.
    y = causal_self_attention(x, w_qkv, b_qkv, w_out, b_out, num_head=H,
                              block_q=16, block_kv=16)
    y = jax.block_until_ready(y)
    np.testing.assert_allclose(np.asarray(y), np.asarray(y_ref),
                               rtol=2e-4, atol=2e-4)

    # Single-tile path (whole sequence in one q/kv tile; default 256 blocks).
    y1 = causal_self_attention(x, w_qkv, b_qkv, w_out, b_out, num_head=H)
    y1 = jax.block_until_ready(y1)
    np.testing.assert_allclose(np.asarray(y1), np.asarray(y_ref),
                               rtol=2e-4, atol=2e-4)

    print("KERNEL_OK")
</pallas_src>

<mosaic_0001>
module attributes {stable_mosaic.version = 11 : i64} {
  func.func @_qkv_proj_kernel(%arg0: i32, %arg1: i32, %arg2: memref<1x16x32xf32, #tpu.memory_space<vmem>>, %arg3: memref<32x96xf32, #tpu.memory_space<vmem>>, %arg4: memref<1x96xf32, #tpu.memory_space<vmem>>, %arg5: memref<1x16x32xf32, #tpu.memory_space<vmem>>, %arg6: memref<1x16x32xf32, #tpu.memory_space<vmem>>, %arg7: memref<1x16x32xf32, #tpu.memory_space<vmem>>) attributes {dimension_semantics = [#tpu.dimension_semantics<parallel>, #tpu.dimension_semantics<parallel>], iteration_bounds = array<i64: 2, 4>, scalar_prefetch = 0 : i64, scratch_operands = 0 : i64, tpu.core_type = #tpu.core_type<tc>, window_params = [{transform_indices = @transform_0, window_bounds = array<i64: 1, 16, 32>}, {pipeline_mode = #tpu.pipeline_mode<synchronous>, transform_indices = @transform_1, window_bounds = array<i64: 32, 96>}, {pipeline_mode = #tpu.pipeline_mode<synchronous>, transform_indices = @transform_2, window_bounds = array<i64: 1, 96>}, {transform_indices = @transform_3, window_bounds = array<i64: 1, 16, 32>}, {transform_indices = @transform_4, window_bounds = array<i64: 1, 16, 32>}, {transform_indices = @transform_5, window_bounds = array<i64: 1, 16, 32>}]} {
    %c0 = arith.constant 0 : index
    %c0_0 = arith.constant 0 : index
    %c0_1 = arith.constant 0 : index
    %0 = vector.load %arg2[%c0, %c0_0, %c0_1] : memref<1x16x32xf32, #tpu.memory_space<vmem>>, vector<1x16x32xf32>
    %1 = vector.shape_cast %0 : vector<1x16x32xf32> to vector<16x32xf32>
    %c0_2 = arith.constant 0 : index
    %c0_3 = arith.constant 0 : index
    %2 = vector.load %arg3[%c0_2, %c0_3] : memref<32x96xf32, #tpu.memory_space<vmem>>, vector<32x96xf32>
    %cst = arith.constant dense<0.000000e+00> : vector<16x96xf32>
    %3 = tpu.matmul %1, %2, %cst {dimension_numbers = #tpu.dot_dimension_numbers<[1], [0], [0], [1], [0, 0, 1, 1], [], []>} : vector<16x32xf32>, vector<32x96xf32>, vector<16x96xf32> -> vector<16x96xf32>
    %c0_4 = arith.constant 0 : index
    %c0_5 = arith.constant 0 : index
    %4 = vector.load %arg4[%c0_4, %c0_5] : memref<1x96xf32, #tpu.memory_space<vmem>>, vector<1x96xf32>
    %5 = vector.shape_cast %4 : vector<1x96xf32> to vector<96xf32>
    %6 = vector.shape_cast %5 : vector<96xf32> to vector<1x96xf32>
    %7 = vector.broadcast %6 : vector<1x96xf32> to vector<16x96xf32>
    %8 = arith.addf %3, %7 : vector<16x96xf32>
    %9 = vector.extract_strided_slice %8 {offsets = [0, 0], sizes = [16, 32], strides = [1, 1]} : vector<16x96xf32> to vector<16x32xf32>
    %c0_6 = arith.constant 0 : index
    %c0_7 = arith.constant 0 : index
    %c0_8 = arith.constant 0 : index
    %10 = vector.load %arg5[%c0_6, %c0_7, %c0_8] : memref<1x16x32xf32, #tpu.memory_space<vmem>>, vector<1x16x32xf32>
    %11 = vector.shape_cast %10 : vector<1x16x32xf32> to vector<16x32xf32>
    %12 = vector.shape_cast %9 : vector<16x32xf32> to vector<1x16x32xf32>
    tpu.vector_store %arg5[%c0_6, %c0_7, %c0_8], %12 {strides = array<i32>} : memref<1x16x32xf32, #tpu.memory_space<vmem>>, vector<1x16x32xf32>,
    %13 = vector.extract_strided_slice %8 {offsets = [0, 32], sizes = [16, 32], strides = [1, 1]} : vector<16x96xf32> to vector<16x32xf32>
    %c0_9 = arith.constant 0 : index
    %c0_10 = arith.constant 0 : index
    %c0_11 = arith.constant 0 : index
    %14 = vector.load %arg6[%c0_9, %c0_10, %c0_11] : memref<1x16x32xf32, #tpu.memory_space<vmem>>, vector<1x16x32xf32>
    %15 = vector.shape_cast %14 : vector<1x16x32xf32> to vector<16x32xf32>
    %16 = vector.shape_cast %13 : vector<16x32xf32> to vector<1x16x32xf32>
    tpu.vector_store %arg6[%c0_9, %c0_10, %c0_11], %16 {strides = array<i32>} : memref<1x16x32xf32, #tpu.memory_space<vmem>>, vector<1x16x32xf32>,
    %17 = vector.extract_strided_slice %8 {offsets = [0, 64], sizes = [16, 32], strides = [1, 1]} : vector<16x96xf32> to vector<16x32xf32>
    %c0_12 = arith.constant 0 : index
    %c0_13 = arith.constant 0 : index
    %c0_14 = arith.constant 0 : index
    %18 = vector.load %arg7[%c0_12, %c0_13, %c0_14] : memref<1x16x32xf32, #tpu.memory_space<vmem>>, vector<1x16x32xf32>
    %19 = vector.shape_cast %18 : vector<1x16x32xf32> to vector<16x32xf32>
    %20 = vector.shape_cast %17 : vector<16x32xf32> to vector<1x16x32xf32>
    tpu.vector_store %arg7[%c0_12, %c0_13, %c0_14], %20 {strides = array<i32>} : memref<1x16x32xf32, #tpu.memory_space<vmem>>, vector<1x16x32xf32>,
    return
  }
  func.func @transform_0(%arg0: i32, %arg1: i32) -> (i32, i32, i32) {
    %c0_i32 = arith.constant 0 : i32
    %c0_i32_0 = arith.constant 0 : i32
    return %arg0, %arg1, %c0_i32 : i32, i32, i32
  }
  func.func @transform_1(%arg0: i32, %arg1: i32) -> (i32, i32) {
    %c0_i32 = arith.constant 0 : i32
    %c0_i32_0 = arith.constant 0 : i32
    %c0_i32_1 = arith.constant 0 : i32
    return %c0_i32, %c0_i32_0 : i32, i32
  }
  func.func @transform_2(%arg0: i32, %arg1: i32) -> (i32, i32) {
    %c0_i32 = arith.constant 0 : i32
    %c0_i32_0 = arith.constant 0 : i32
    %c0_i32_1 = arith.constant 0 : i32
    return %c0_i32, %c0_i32_0 : i32, i32
  }
  func.func @transform_3(%arg0: i32, %arg1: i32) -> (i32, i32, i32) {
    %c0_i32 = arith.constant 0 : i32
    %c0_i32_0 = arith.constant 0 : i32
    return %arg0, %arg1, %c0_i32 : i32, i32, i32
  }
  func.func @transform_4(%arg0: i32, %arg1: i32) -> (i32, i32, i32) {
    %c0_i32 = arith.constant 0 : i32
    %c0_i32_0 = arith.constant 0 : i32
    return %arg0, %arg1, %c0_i32 : i32, i32, i32
  }
  func.func @transform_5(%arg0: i32, %arg1: i32) -> (i32, i32, i32) {
    %c0_i32 = arith.constant 0 : i32
    %c0_i32_0 = arith.constant 0 : i32
    return %arg0, %arg1, %c0_i32 : i32, i32, i32
  }
}

</mosaic_0001>

<bundles_post_ra>
// kernel: tpu_custom_call.1
= control target key start
LH: loop header
LB: loop body
LE: loop exit
PB: predicated region body
PF: predicated region fallthrough
CT: control target
= control target key end

     0   :  { %s701_s18 = smov 0   ;;  %s703_s19 = smov 0   ;;  %s781_s0 = inlined_call_operand.vmem [shape: f32[2,64,32], index: 0, kind: input, shape index: {}]   ;;  %s782_s1 = inlined_call_operand.vmem [shape: f32[32,96], index: 1, kind: input, shape index: {}]   ;;  %s783_s2 = inlined_call_operand.vmem [shape: f32[1,96], index: 2, kind: input, shape index: {}]   ;;  %s784_s3 = inlined_call_operand.vmem [shape: f32[2,64,32], index: 3, kind: output, shape index: {0}]   ;;  %s785_s4 = inlined_call_operand.vmem [shape: f32[2,64,32], index: 4, kind: output, shape index: {1}]   ;;  %s786_s5 = inlined_call_operand.vmem [shape: f32[2,64,32], index: 5, kind: output, shape index: {2}]  }
   0x1   :  { %s705_s20 = smov 0   ;;  %s707_s21 = smov 0  }
   0x2   :  { %s709_s22 = smov 0  }
   0x3 LB: > { %s25_s23 = sadd.s32 1, %s659_s20  ;;  %s28_s24 = sadd.s32 1, %s663_s21  ;;  %s667_s22 = sphi %s709_s22, %s16_s22   ;;  %s663_s21 = sphi %s707_s21, %s790_s21   ;;  %s659_s20 = sphi %s705_s20, %s789_s20   ;;  %s655_s19 = sphi %s703_s19, %s788_s19   ;;  %s651_s18 = sphi %s701_s18, %s787_s18  }
   0x4   : > { %p26_p0 = scmp.ge.s32.totalorder %s25_s23, 4  ;;  %p565_p1 = scmp.ge.s32.totalorder %s667_s22, 1 }
   0x5   : > { %p217_p2 = scmp.lt.s32.totalorder %s667_s22, 9 }
   0x6   : > { %s792_s23 = smov (%p26_p0, %s25_s23), 0  ;;  %s794_s24 = smov (!%p26_p0, %s28_s24), %s663_s21 }
   0x7   : > { %p218_p3 = pnand %p565_p1, %p217_p2  ;;  %p30_p4 = scmp.ge.s32.totalorder %s794_s24, 2 }
   0x8   : > { %s566_s29 = sshll.u32 (!%p218_p3), %s651_s18, 1  ;;  %p272_p5 = scmp.lt.s32.totalorder (!%p218_p3), %s655_s19, 1 }
   0x9   : > { %s796_s24 = smov (%p30_p4, %s794_s24), 0  ;;  %221 = sbr.rel (%p218_p3) target bundleno = 275 (0x113), region = 32 }
   0xa   : > { %p274_p6 = scmp.lt.s32.totalorder (!%p218_p3), %s566_s29, 7  ;;  %s669_s25 = smov (!%p218_p3), 64  }
   0xb   : > { %s670_s26 = smov (!%p218_p3), 96  }
   0xe   : > { %v316_v0 = vld [vmem:[%s782_s1 + $0x18] sm:$0xff]  ;;  %v315_v1 = vld [vmem:[%s782_s1 + $0x10] sm:$0xff]  ;;  %v314_v2 = vld [vmem:[%s782_s1 + $0x8] sm:$0xff]  ;;  %s798_s19 = smov (!%p272_p5, %s655_s19), 1  ;;  %s800_s29 = smov (!%p274_p6, %s566_s29), 7  ;;  %vm321_vm0 = vcmask 261120  }
   0xf   : > { %340 = vmatpush.msra.mxu0 %v316_v0  ;;  %582 = vmatpush.msra.mxu1 %v316_v0  ;;  %v313_v3 = vld [vmem:[%s782_s1] sm:$0xff]  ;;  %s567_s9 = sshll.u32 %s798_s19, 3 }
  0x10   : > { %s277_s10 = sadd.s32 %s567_s9, %s800_s29  ;;  %v628_v6 = vld [vmem:[%s783_s2] ss:$0 sm:$0xff] }
  0x11   : > { %341 = vmatpush.msra.mxu0 %v315_v1  ;;  %583 = vmatpush.msra.mxu1 %v315_v1  ;;  %s568_s11 = sshll.u32 %s277_s10, 3 }
  0x12   : > { %s279_s14 = scalar_lea.vmem %s781_s0, %s568_s11  ;;  %s289_s19 = scalar_lea.vmem %s784_s3, %s568_s11 }
  0x13   : > { %342 = vmatpush.msra.mxu0 %v314_v2  ;;  %584 = vmatpush.msra.mxu1 %v314_v2  ;;  %v311_v4 = vld [vmem:[%s279_s14] sm:$0xff]  ;;  %v312_v5 = vld [vmem:[%s279_s14 + $0x8] sm:$0xff]  ;;  %s309_s29 = scalar_lea.vmem %s786_s5, %s568_s11  ;;  %s299_s7 = scalar_lea.vmem %s785_s4, %s568_s11 }
  0x15   : > { %343 = vmatpush.msra.mxu0 %v313_v3  ;;  %585 = vmatpush.msra.mxu1 %v313_v3 }
  0x16   : > { %578 = vmatmul.msk.f32.vlgmr.msra.gmra.mxu0 %vm321_vm0, %v311_v4  ;;  %579 = vmatmul.msk.f32.vlgmr.msra.gmra.mxu1 %vm321_vm0, %v312_v5 }
  0x93   : > { %v345_v7 = vpop.f32.mrf.mxu0  ;;  %v348_v8 = vpop.f32.mrf.mxu1 }
  0x94   : > { %v346_v9 = vadd.f32 %v628_v6, %v345_v7  ;;  %v349_v10 = vadd.f32 %v628_v6, %v348_v8 }
  0x96   : > { %351 = vst.msk [vmem:[%s289_s19] sm:$0xff] %vm321_vm0, %v346_v9  ;;  %363 = vrot.lane.b32.xlu1 %v346_v9, %s669_s25  ;;  %355 = vrot.lane.b32.xlu0 %v346_v9, %s670_s26 }
  0x97   : > { %352 = vst.msk [vmem:[%s289_s19 + $0x8] sm:$0xff] %vm321_vm0, %v349_v10 }
  0x9e   : > { %365 = vrot.lane.b32.xlu1 %v349_v10, %s669_s25  ;;  %357 = vrot.lane.b32.xlu0 %v349_v10, %s670_s26 }
 0x108   : > { %v364_v11 = vpop.permute.xlu1 %363  ;;  %v356_v12 = vpop.permute.xlu0 %355 }
 0x109   : > { %369 = vst.msk [vmem:[%s309_s29] sm:$0xff] %vm321_vm0, %v364_v11 }
 0x10a   : > { %361 = vst.msk [vmem:[%s299_s7] sm:$0xff] %vm321_vm0, %v356_v12 }
 0x110   : > { %v366_v13 = vpop.permute.xlu1 %365  ;;  %v358_v14 = vpop.permute.xlu0 %357 }
 0x111   : > { %370 = vst.msk [vmem:[%s309_s29 + $0x8] sm:$0xff] %vm321_vm0, %v366_v13 }
 0x112   : > { %362 = vst.msk [vmem:[%s299_s7 + $0x8] sm:$0xff] %vm321_vm0, %v358_v14 }
 0x113 PF: > { %s16_s22 = sadd.s32 1, %s667_s22   ;;  %s787_s18 = smov %s659_s20 }
 0x114   : > { %p13_p7 = scmp.ge.s32.totalorder %s16_s22, 10   ;;  %s788_s19 = smov %s663_s21 }
 0x115   : > { %s789_s20 = smov %s792_s23  ;;  %s790_s21 = smov %s796_s24 }
 0x116   :  { %15 = sbr.rel (!%p13_p7) target bundleno = 3 (0x3), region = 86 }

</bundles_post_ra>
